<compile_context>
chip_gen: v5e
topology: v5e:2x2
jax: 0.10.0
libtpu: 0.0.40
codegen_flags: <defaults>
</compile_context>

<pallas_src>
import jax
import jax.numpy as jnp
from jax.experimental import pallas as pl
from jax.experimental.pallas import tpu as pltpu


def _pad_prompt_kernel(x_ref, prompt_ref, o_ref):
    # x_ref:      (TB, C*H_out*W_out)  pre-padded input rows (flattened)
    # prompt_ref: (1,  C*H_out*W_out)  program * mask (batch-invariant)
    # o_ref:      (TB, C*H_out*W_out)
    o_ref[...] = jnp.clip(x_ref[...] + prompt_ref[...], 0.0, 1.0)


def _pick_batch_block(batch, row_bytes):
    """Batch rows per grid step: ~2 MiB output tile, sublane-aligned (x8)."""
    target_rows = (2 << 20) // max(row_bytes, 1)
    if target_rows >= batch:
        return batch                      # single step covers the whole batch
    tb = max(8, (target_rows // 8) * 8)   # block dim must be a multiple of 8
    return min(tb, batch)


def pad_visual_prompt(x, program, mask, *, l_pad, r_pad):
    """x: (B, C, H_in, W_in); program/mask: (C, H_out, W_out).

    Returns (B, C, H_out, W_out) = clamp(zero_pad(x) + program * mask, 0, 1).
    """
    B, C, h_in, w_in = x.shape
    C2, h_out, w_out = program.shape
    assert C == C2
    assert l_pad + r_pad + h_in == h_out and l_pad + r_pad + w_in == w_out

    out_dtype = jnp.result_type(x.dtype, program.dtype, mask.dtype)
    hw = C * h_out * w_out

    # Hoisted batch-invariant / cheap XLA prep: prompt product and zero-pad.
    prompt = (program * mask).reshape(1, hw).astype(out_dtype)
    x_pad = jnp.pad(
        x.astype(out_dtype),
        ((0, 0), (0, 0), (l_pad, r_pad), (l_pad, r_pad)),
        constant_values=0.0,
    ).reshape(B, hw)

    row_bytes = hw * jnp.dtype(out_dtype).itemsize
    tb = _pick_batch_block(B, row_bytes)
    grid = (pl.cdiv(B, tb),)

    out_flat = pl.pallas_call(
        _pad_prompt_kernel,
        out_shape=jax.ShapeDtypeStruct((B, hw), out_dtype),
        grid_spec=pltpu.PrefetchScalarGridSpec(
            num_scalar_prefetch=0,
            grid=grid,
            in_specs=[
                pl.BlockSpec((tb, hw), lambda b: (b, 0)),   # batch rows, lane-dense
                pl.BlockSpec((1, hw), lambda b: (0, 0)),    # resident prompt
            ],
            out_specs=pl.BlockSpec((tb, hw), lambda b: (b, 0)),
        ),
        compiler_params=pltpu.CompilerParams(
            dimension_semantics=("parallel",),
        ),
    )(x_pad, prompt)

    return out_flat.reshape(B, C, h_out, w_out)


def make_mask(channels, output_size, pad):
    """Border mask: 1 on the outer `pad`-wide ring, 0 in the center (matches F.pad(value=1))."""
    if output_size > 2 * pad:
        center = jnp.zeros(
            (channels, output_size - 2 * pad, output_size - 2 * pad), jnp.float32
        )
        return jnp.pad(
            center,
            ((0, 0), (pad, pad), (pad, pad)),
            mode="constant",
            constant_values=1.0,
        )
    elif output_size == 2 * pad:
        return jnp.ones((channels, output_size, output_size), jnp.float32)
    else:
        raise ValueError("Pad Should Not Exceed Half Of Output Size")


def reference(x, program, mask, l_pad, r_pad):
    x_pad = jnp.pad(
        x, ((0, 0), (0, 0), (l_pad, r_pad), (l_pad, r_pad)), constant_values=0.0
    )
    return jnp.clip(x_pad + (program * mask)[None], 0.0, 1.0)


if __name__ == "__main__":
    # Module config (small but consistent with the forward pass):
    pad_size = 4
    input_size = 16
    output_size = 32
    channels = 3  # fixed by the module (program has 3 channels)
    batch = 2

    l_pad = int((output_size - input_size + 1) / 2)
    r_pad = int((output_size - input_size) / 2)

    key = jax.random.PRNGKey(0)
    kx, kp = jax.random.split(key)

    # Module initializes `program` to zeros; use deterministic random values here
    # so the kernel path is exercised non-trivially.
    x = jax.random.uniform(kx, (batch, channels, input_size, input_size), jnp.float32)
    program = 0.5 * jax.random.normal(
        kp, (channels, output_size, output_size), jnp.float32
    )
    mask = make_mask(channels, output_size, pad_size)

    out = pad_visual_prompt(x, program, mask, l_pad=l_pad, r_pad=r_pad)
    out = jax.block_until_ready(out)

    ref = reference(x, program, mask, l_pad, r_pad)
    assert out.shape == (batch, channels, output_size, output_size)
    assert jnp.allclose(out, ref, atol=1e-6), "mismatch vs reference"

    print("KERNEL_OK")
</pallas_src>

<mosaic_0001>
module attributes {stable_mosaic.version = 11 : i64} {
  func.func @_pad_prompt_kernel(%arg0: i32, %arg1: memref<2x3072xf32, #tpu.memory_space<vmem>>, %arg2: memref<1x3072xf32, #tpu.memory_space<vmem>>, %arg3: memref<2x3072xf32, #tpu.memory_space<vmem>>) attributes {dimension_semantics = [#tpu.dimension_semantics<parallel>], iteration_bounds = array<i64: 1>, scalar_prefetch = 0 : i64, scratch_operands = 0 : i64, tpu.core_type = #tpu.core_type<tc>, window_params = [{transform_indices = @transform_0, window_bounds = array<i64: 2, 3072>}, {pipeline_mode = #tpu.pipeline_mode<synchronous>, transform_indices = @transform_1, window_bounds = array<i64: 1, 3072>}, {transform_indices = @transform_2, window_bounds = array<i64: 2, 3072>}]} {
    %c0 = arith.constant 0 : index
    %c0_0 = arith.constant 0 : index
    %0 = vector.load %arg1[%c0, %c0_0] : memref<2x3072xf32, #tpu.memory_space<vmem>>, vector<2x3072xf32>
    %c0_1 = arith.constant 0 : index
    %c0_2 = arith.constant 0 : index
    %1 = vector.load %arg2[%c0_1, %c0_2] : memref<1x3072xf32, #tpu.memory_space<vmem>>, vector<1x3072xf32>
    %2 = vector.broadcast %1 : vector<1x3072xf32> to vector<2x3072xf32>
    %3 = arith.addf %0, %2 : vector<2x3072xf32>
    %cst = arith.constant 0.000000e+00 : f32
    %cst_3 = arith.constant 1.000000e+00 : f32
    %4 = vector.broadcast %cst : f32 to vector<2x3072xf32>
    %5 = arith.maximumf %4, %3 : vector<2x3072xf32>
    %6 = vector.broadcast %cst_3 : f32 to vector<2x3072xf32>
    %7 = arith.minimumf %6, %5 : vector<2x3072xf32>
    %c0_4 = arith.constant 0 : index
    %c0_5 = arith.constant 0 : index
    %8 = vector.load %arg3[%c0_4, %c0_5] : memref<2x3072xf32, #tpu.memory_space<vmem>>, vector<2x3072xf32>
    tpu.vector_store %arg3[%c0_4, %c0_5], %7 {strides = array<i32>} : memref<2x3072xf32, #tpu.memory_space<vmem>>, vector<2x3072xf32>,
    return
  }
  func.func @transform_0(%arg0: i32) -> (i32, i32) {
    %c0_i32 = arith.constant 0 : i32
    %c0_i32_0 = arith.constant 0 : i32
    return %arg0, %c0_i32 : i32, i32
  }
  func.func @transform_1(%arg0: i32) -> (i32, i32) {
    %c0_i32 = arith.constant 0 : i32
    %c0_i32_0 = arith.constant 0 : i32
    %c0_i32_1 = arith.constant 0 : i32
    return %c0_i32, %c0_i32_0 : i32, i32
  }
  func.func @transform_2(%arg0: i32) -> (i32, i32) {
    %c0_i32 = arith.constant 0 : i32
    %c0_i32_0 = arith.constant 0 : i32
    return %arg0, %c0_i32 : i32, i32
  }
}

</mosaic_0001>

<bundles_post_ra>
// kernel: tpu_custom_call.1
= control target key start
LH: loop header
LB: loop body
LE: loop exit
PB: predicated region body
PF: predicated region fallthrough
CT: control target
= control target key end

     0   :  { %7 = vsyncpa [#allocation3], 0  ;;  %s289_s0 = inlined_call_operand.hbm [shape: f32[2,3072], index: 0, kind: input, shape index: {}]   ;;  %s290_s1 = inlined_call_operand.hbm [shape: f32[1,3072], index: 1, kind: input, shape index: {}]   ;;  %s291_s2 = inlined_call_operand.hbm [shape: f32[2,3072], index: 2, kind: output, shape index: {}]  }
   0x1   :  { %8 = vsyncpa [#allocation6], 0 }
   0x2   :  { %9 = vsyncpa [#allocation4], 0  ;;  %s15_s11 = sshll.u32 %s289_s0, 4  ;;  %s244_s12 = smov [#allocation2]   ;;  %s16_s11 = int_to_ptr.hbm [resolvable:$true] %s15_s11 }
   0x3   :  { %s17_s13 = sshll.u32 %s244_s12, 4  ;;  %s26_s16 = sshll.u32 %s290_s1, 4  ;;  %s18_s13 = int_to_ptr.vmem [resolvable:$true] %s17_s13  ;;  %s27_s16 = int_to_ptr.hbm [resolvable:$true] %s26_s16 }
   0x4   :  { %20 = dma.hbm_to_vmem [thread:$0]  %s16_s11, 768, %s18_s13, [#allocation3]  }
   0x5   :  { %s245_s17 = smov [#allocation5]  }
   0x6   :  { %s28_s18 = sshll.u32 %s245_s17, 4  ;;  %s29_s18 = int_to_ptr.vmem [resolvable:$true] %s28_s18 }
   0x7   :  { %31 = dma.hbm_to_vmem [thread:$0]  %s27_s16, 384, %s29_s18, [#allocation6]  }
   0x8   :  { %238 = dma.done.wait [#allocation3], 768  }
   0x9   :  { %239 = vsyncadd [#allocation3], 4294966528 }
   0xa   :  { %240 = dma.done.wait [#allocation6], 384  }
   0xb   :  { %241 = vsyncadd [#allocation6], 4294966912  ;;  %v46_v0 = vld [vmem:[#allocation5] sm:$0xff]  ;;  %vm94_vm0 = vcmask 1041408   ;;  %vm96_vm1 = vcmask 1045508   ;;  %vm98_vm2 = vcmask 1043456  }
   0xc   :  { %v52_v1 = vperm.slane %v46_v0, 0  ;;  %v53_v2 = vperm.slane %v46_v0, 1  ;;  %v54_v3 = vperm.slane %v46_v0, 2  ;;  %v55_v4 = vperm.slane %v46_v0, 3  ;;  %v47_v5 = vld [vmem:[#allocation5 + $0x8] sm:$0xff]  ;;  %v40_v14 = vld [vmem:[#allocation2] sm:$0xff] }
   0xd   :  { %v56_v6 = vperm.slane %v46_v0, 4  ;;  %v57_v7 = vperm.slane %v46_v0, 5  ;;  %v58_v8 = vperm.slane %v46_v0, 6  ;;  %v59_v9 = vperm.slane %v46_v0, 7  ;;  %v41_v21 = vld [vmem:[#allocation2 + $0x8] sm:$0xff]  ;;  %v42_v33 = vld [vmem:[#allocation2 + $0x10] sm:$0xff] }
   0xe   :  { %v76_v10 = vrot.slane %v53_v2, 6  ;;  %v77_v11 = vrot.slane %v54_v3, 4  ;;  %v78_v12 = vrot.slane %v55_v4, 2  ;;  %v60_v13 = vperm.slane %v47_v5, 0  ;;  %v48_v41 = vld [vmem:[#allocation5 + $0x10] sm:$0xff]  ;;  %v43_v51 = vld [vmem:[#allocation2 + $0x18] sm:$0xff] }
   0xf   :  { %v79_v15 = vrot.slane %v57_v7, 6  ;;  %v80_v16 = vrot.slane %v58_v8, 4  ;;  %v81_v17 = vrot.slane %v59_v9, 2  ;;  %v61_v18 = vperm.slane %v47_v5, 1  ;;  %v44_v3 = vld [vmem:[#allocation2 + $0x20] sm:$0xff]  ;;  %s246_s0 = smov [#allocation7]  }
  0x10   :  { %v95_v19 = vsel %vm94_vm0, %v52_v1, %v76_v10  ;;  %v97_v20 = vsel %vm96_vm1, %v77_v11, %v78_v12  ;;  %v62_v22 = vperm.slane %v47_v5, 2  ;;  %v63_v23 = vperm.slane %v47_v5, 3  ;;  %s150_s1 = sshll.u32 %s246_s0, 4  ;;  %s152_s21 = sshll.u32 %s291_s2, 4  ;;  %s151_s1 = int_to_ptr.vmem [resolvable:$true] %s150_s1  ;;  %s153_s21 = int_to_ptr.hbm [resolvable:$true] %s152_s21 }
  0x11   :  { %v99_v24 = vsel %vm98_vm2, %v95_v19, %v97_v20  ;;  %v100_v25 = vsel %vm94_vm0, %v56_v6, %v79_v15  ;;  %v101_v26 = vsel %vm96_vm1, %v80_v16, %v81_v17  ;;  %v82_v27 = vrot.slane %v61_v18, 6  ;;  %v45_v15 = vld [vmem:[#allocation2 + $0x28] sm:$0xff] }
  0x12   :  { %v121_v28 = vadd.f32 %v99_v24, %v40_v14  ;;  %v102_v29 = vsel %vm98_vm2, %v100_v25, %v101_v26  ;;  %v83_v30 = vrot.slane %v62_v22, 4  ;;  %v84_v31 = vrot.slane %v63_v23, 2 }
  0x13   :  { %v122_v32 = vadd.f32 %v102_v29, %v41_v21  ;;  %v103_v34 = vsel %vm94_vm0, %v60_v13, %v82_v27  ;;  %v64_v35 = vperm.slane %v47_v5, 4  ;;  %v65_v36 = vperm.slane %v47_v5, 5 }
  0x14   :  { %v127_v37 = vmax.f32 %v121_v28, 0.0  ;;  %v104_v38 = vsel %vm96_vm1, %v83_v30, %v84_v31  ;;  %v66_v39 = vperm.slane %v47_v5, 6  ;;  %v67_v40 = vperm.slane %v47_v5, 7 }
  0x15   :  { %v128_v42 = vmax.f32 %v122_v32, 0.0  ;;  %v105_v43 = vsel %vm98_vm2, %v103_v34, %v104_v38  ;;  %v85_v44 = vrot.slane %v65_v36, 6  ;;  %v68_v45 = vperm.slane %v48_v41, 0 }
  0x16   :  { %v133_v46 = vmin.f32 %v127_v37, 1.0  ;;  %v123_v47 = vadd.f32 %v105_v43, %v42_v33  ;;  %v86_v48 = vrot.slane %v66_v39, 4  ;;  %v87_v49 = vrot.slane %v67_v40, 2 }
  0x17   :  { %v134_v50 = vmin.f32 %v128_v42, 1.0  ;;  %v106_v52 = vsel %vm94_vm0, %v64_v35, %v85_v44  ;;  %v69_v53 = vperm.slane %v48_v41, 1  ;;  %v70_v54 = vperm.slane %v48_v41, 2 }
  0x18   :  { %139 = vst [vmem:[#allocation7] sm:$0xff] %v133_v46  ;;  %v129_v55 = vmax.f32 %v123_v47, 0.0  ;;  %v107_v56 = vsel %vm96_vm1, %v86_v48, %v87_v49  ;;  %v71_v57 = vperm.slane %v48_v41, 3  ;;  %v72_v58 = vperm.slane %v48_v41, 4 }
  0x19   :  { %140 = vst [vmem:[#allocation7 + $0x8] sm:$0xff] %v134_v50  ;;  %v108_v59 = vsel %vm98_vm2, %v106_v52, %v107_v56  ;;  %v88_v60 = vrot.slane %v69_v53, 6  ;;  %v89_v61 = vrot.slane %v70_v54, 4  ;;  %v73_v62 = vperm.slane %v48_v41, 5 }
  0x1a   :  { %v135_v63 = vmin.f32 %v129_v55, 1.0  ;;  %v124_v0 = vadd.f32 %v108_v59, %v43_v51  ;;  %v90_v1 = vrot.slane %v71_v57, 2  ;;  %v74_v2 = vperm.slane %v48_v41, 6 }
  0x1b   :  { %v109_v4 = vsel %vm94_vm0, %v68_v45, %v88_v60  ;;  %v75_v5 = vperm.slane %v48_v41, 7  ;;  %v91_v6 = vrot.slane %v73_v62, 6 }
  0x1c   :  { %141 = vst [vmem:[#allocation7 + $0x10] sm:$0xff] %v135_v63  ;;  %v130_v7 = vmax.f32 %v124_v0, 0.0  ;;  %v110_v8 = vsel %vm96_vm1, %v89_v61, %v90_v1  ;;  %v92_v9 = vrot.slane %v74_v2, 4 }
  0x1d   :  { %v111_v10 = vsel %vm98_vm2, %v109_v4, %v110_v8  ;;  %v93_v11 = vrot.slane %v75_v5, 2  ;;  %v112_v12 = vsel %vm94_vm0, %v72_v58, %v91_v6 }
  0x1e   :  { %v136_v13 = vmin.f32 %v130_v7, 1.0  ;;  %v125_v14 = vadd.f32 %v111_v10, %v44_v3 }
  0x1f   :  { %v113_v16 = vsel %vm96_vm1, %v92_v9, %v93_v11 }
  0x20   :  { %142 = vst [vmem:[#allocation7 + $0x18] sm:$0xff] %v136_v13  ;;  %v131_v17 = vmax.f32 %v125_v14, 0.0  ;;  %v114_v18 = vsel %vm98_vm2, %v112_v12, %v113_v16 }
  0x21   :  { %v126_v19 = vadd.f32 %v114_v18, %v45_v15 }
  0x22   :  { %v137_v20 = vmin.f32 %v131_v17, 1.0 }
  0x23   :  { %v132_v21 = vmax.f32 %v126_v19, 0.0 }
  0x24   :  { %143 = vst [vmem:[#allocation7 + $0x20] sm:$0xff] %v137_v20 }
  0x25   :  { %v138_v22 = vmin.f32 %v132_v21, 1.0 }
  0x27   :  { %144 = vst [vmem:[#allocation7 + $0x28] sm:$0xff] %v138_v22 }
  0x28   :  { %155 = dma.vmem_to_hbm [thread:$0]  %s151_s1, 768, %s153_s21, [#allocation4]  }
  0x29   :  { %242 = dma.done.wait [#allocation4], 768  }
  0x2a   :  { %243 = vsyncadd [#allocation4], 4294966528 }
  0x2b   :  { %160 = vsyncpa [#allocation3], 1 }
  0x2c   :  { %161 = vsyncpa [#allocation6], 1 }
  0x2d   :  { %162 = vsyncpa [#allocation4], 1 }

</bundles_post_ra>
